<compile_context>
chip_gen: v7x
topology: tpu7x:2x2x1
jax: 0.10.0
libtpu: 0.0.40
codegen_flags: <defaults>
</compile_context>

<pallas_src>
import functools

import jax
import jax.numpy as jnp
from jax.experimental import pallas as pl
from jax.experimental.pallas import tpu as pltpu


def _round_up(x, m):
    return (x + m - 1) // m * m


def _pick_tiles(n):
    """Return (n_pad, tm, tk)."""
    if n <= 128:
        return 128, 128, 128
    if n <= 256:
        return 256, 128, 256          # 2 row tiles -> both v7x cores busy
    if n <= 512:
        return 512, 256, 512
    return _round_up(n, 512), 256, 512


# -----------------------------------------------------------------------------
# Pallas kernel:
#   o[i] = dinv[i] * ( sum_k A[i,k] @ H[k] ) + b
# A: unnormalized (A + I) adjacency, bf16 (exact 0/1 values)
# H: (D^{-1/2} X) W^T, bf16, lane-padded to fout_pad (multiple of 128)
# dinv: row scale D^{-1/2}, f32;  b: bias, f32
# The N x N reduction is k-tiled; the output block is the accumulator.
# -----------------------------------------------------------------------------
def gcn_kernel(a_ref, h_ref, dinv_ref, b_ref, o_ref, *, tk, h_resident):
    k = pl.program_id(1)

    @pl.when(k == 0)
    def _():
        o_ref[...] = jnp.zeros_like(o_ref)

    if h_resident:
        kstart = pl.multiple_of(k * tk, tk)
        h_blk = h_ref[pl.ds(kstart, tk), :]       # slice of VMEM-resident H
    else:
        h_blk = h_ref[...]                        # per-step streamed block

    # Dominant matmul: bf16 x bf16 on the MXU, f32 accumulation, lane-dense
    # (fout_pad = multiple of 128) output.
    o_ref[...] += jnp.dot(a_ref[...], h_blk, preferred_element_type=jnp.float32)

    @pl.when(k == pl.num_programs(1) - 1)
    def _():
        o_ref[...] = dinv_ref[...] * o_ref[...] + b_ref[...]


def gcn_layer_pallas(adj_bf16, h_bf16, dinv_col, b_pad, *, tm, tk):
    n_pad = adj_bf16.shape[0]
    fout_pad = h_bf16.shape[1]

    # Keep H fully VMEM-resident unless it is too large (v7x: 32 MiB scoped
    # VMEM default; 2 buffers x n_pad x fout_pad x 2B must stay well below it).
    h_resident = (n_pad * fout_pad * 2) <= (4 * 1024 * 1024)
    if h_resident:
        h_spec = pl.BlockSpec((n_pad, fout_pad), lambda i, k: (0, 0))
    else:
        h_spec = pl.BlockSpec((tk, fout_pad), lambda i, k: (k, 0))

    grid = (n_pad // tm, n_pad // tk)
    return pl.pallas_call(
        functools.partial(gcn_kernel, tk=tk, h_resident=h_resident),
        out_shape=jax.ShapeDtypeStruct((n_pad, fout_pad), jnp.float32),
        grid=grid,
        in_specs=[
            pl.BlockSpec((tm, tk), lambda i, k: (i, k)),        # A tile (bf16)
            h_spec,                                             # H (bf16)
            pl.BlockSpec((tm, 1), lambda i, k: (i, 0)),         # dinv rows
            pl.BlockSpec((1, fout_pad), lambda i, k: (0, 0)),   # bias
        ],
        out_specs=pl.BlockSpec((tm, fout_pad), lambda i, k: (i, 0)),
        compiler_params=pltpu.CompilerParams(
            dimension_semantics=("parallel", "arbitrary"),
        ),
    )(adj_bf16, h_bf16, dinv_col, b_pad)


# -----------------------------------------------------------------------------
# Full GCNConv forward: O(E) glue + Pallas kernel.
# -----------------------------------------------------------------------------
def gcn_conv(x, edge_index, w_t, bias):
    n, fin = x.shape
    fout = w_t.shape[1]
    fout_pad = _round_up(fout, 128)
    n_pad, tm, tk = _pick_tiles(n)

    src = edge_index[0].astype(jnp.int32)
    dst = edge_index[1].astype(jnp.int32)
    e = src.shape[0]
    idx_n = jnp.arange(n, dtype=jnp.int32)

    # add_remaining_self_loops: add a self loop only where none exists.
    is_self = (src == dst).astype(jnp.float32)
    self_mult = jax.ops.segment_sum(is_self, dst, num_segments=n)
    add_loop = (self_mult == 0.0).astype(jnp.float32)

    all_dst = jnp.concatenate([dst, idx_n])
    all_src = jnp.concatenate([src, idx_n])
    all_val = jnp.concatenate([jnp.ones((e,), jnp.float32), add_loop])

    # O(E) in-degree (including self loops) and symmetric normalization.
    deg = jax.ops.segment_sum(all_val, all_dst, num_segments=n)
    dinv = jnp.where(deg > 0.0, jax.lax.rsqrt(deg), 0.0)        # [n]

    # Unnormalized dense adjacency built directly in bf16 (0/1 exact),
    # single scatter pass: edges + missing self loops together.
    adj = (
        jnp.zeros((n_pad, n_pad), jnp.bfloat16)
        .at[all_dst, all_src]
        .add(all_val.astype(jnp.bfloat16))
    )

    # Tiny dense part in f32: H = (D^{-1/2} X) @ W^T, then pad + cast to bf16.
    h = (x.astype(jnp.float32) * dinv[:, None]) @ w_t.astype(jnp.float32)
    h_pad = jnp.zeros((n_pad, fout_pad), jnp.float32).at[:n, :fout].set(h)
    h_bf16 = h_pad.astype(jnp.bfloat16)

    dinv_col = jnp.zeros((n_pad, 1), jnp.float32).at[:n, 0].set(dinv)
    b_pad = jnp.zeros((1, fout_pad), jnp.float32).at[:, :fout].set(
        bias.reshape(1, fout).astype(jnp.float32)
    )

    out = gcn_layer_pallas(adj, h_bf16, dinv_col, b_pad, tm=tm, tk=tk)
    return out[:n, :fout]


_gcn_conv_jit = jax.jit(gcn_conv)


# -----------------------------------------------------------------------------
# GAEEnc module (forward == gcn1 only, matching the PyTorch forward)
# -----------------------------------------------------------------------------
class GAEEncPallas:
    def __init__(self, in_features, out_features, key):
        k1, k2 = jax.random.split(key, 2)
        # gcn1 parameters: glorot-uniform (symmetric in fan_in/fan_out, so
        # sampling directly in the [Fin, Fout] = W^T layout is equivalent).
        s1 = jnp.sqrt(6.0 / (in_features + out_features))
        self.w1_t = jax.random.uniform(
            k1, (in_features, out_features), jnp.float32, -s1, s1
        )
        self.b1 = jnp.zeros((out_features,), jnp.float32)
        # gcn2 parameters exist (as in __init__) but are unused by forward.
        s2 = jnp.sqrt(6.0 / (2 * out_features + out_features))
        self.w2_t = jax.random.uniform(
            k2, (2 * out_features, out_features), jnp.float32, -s2, s2
        )
        self.b2 = jnp.zeros((out_features,), jnp.float32)

    def forward(self, x, edge_index):
        return _gcn_conv_jit(x, edge_index, self.w1_t, self.b1)


# -----------------------------------------------------------------------------
if __name__ == "__main__":
    key = jax.random.PRNGKey(0)
    k_x, k_mod = jax.random.split(key)

    num_nodes = 16
    in_features = 8
    out_features = 32

    # deterministic node features
    x = jax.random.normal(k_x, (num_nodes, in_features), jnp.float32)

    # deterministic edge_index: bidirectional ring + one explicit self loop
    idx = jnp.arange(num_nodes, dtype=jnp.int32)
    nxt = (idx + 1) % num_nodes
    src = jnp.concatenate([idx, nxt, jnp.array([0], jnp.int32)])
    dst = jnp.concatenate([nxt, idx, jnp.array([0], jnp.int32)])
    edge_index = jnp.stack([src, dst], axis=0)  # [2, 33]

    model = GAEEncPallas(in_features, out_features, k_mod)
    out = model.forward(x, edge_index)
    out = jax.block_until_ready(out)

    # Independent pure-JAX f32 reference (PyG GCNConv semantics).
    A = jnp.zeros((num_nodes, num_nodes), jnp.float32).at[dst, src].add(1.0)
    dvals = A[idx, idx]
    A = A.at[idx, idx].set(jnp.where(dvals > 0.0, dvals, 1.0))
    deg = A.sum(axis=1)
    dis = jnp.where(deg > 0.0, deg ** -0.5, 0.0)
    a_hat = dis[:, None] * A * dis[None, :]
    ref = (a_hat @ x) @ model.w1_t + model.b1[None, :]

    assert out.shape == (num_nodes, out_features)
    # Tolerance accounts for the bf16 rounding of the H operand on the MXU
    # (A itself is exact 0/1 in bf16); errors are ~1e-3 in practice.
    assert jnp.allclose(out, ref, atol=2e-2, rtol=2e-2), float(
        jnp.max(jnp.abs(out - ref))
    )
    print("KERNEL_OK")
</pallas_src>

<mosaic_0001>
module attributes {stable_mosaic.version = 11 : i64} {
  func.func @gcn_kernel(%arg0: i32, %arg1: i32, %arg2: memref<128x128xbf16, #tpu.memory_space<vmem>>, %arg3: memref<128x128xbf16, #tpu.memory_space<vmem>>, %arg4: memref<128x1xf32, #tpu.memory_space<vmem>>, %arg5: memref<1x128xf32, #tpu.memory_space<vmem>>, %arg6: memref<128x128xf32, #tpu.memory_space<vmem>>) attributes {dimension_semantics = [#tpu.dimension_semantics<parallel>, #tpu.dimension_semantics<arbitrary>], iteration_bounds = array<i64: 1, 1>, scalar_prefetch = 0 : i64, scratch_operands = 0 : i64, tpu.core_type = #tpu.core_type<tc>, window_params = [{transform_indices = @transform_0, window_bounds = array<i64: 128, 128>}, {pipeline_mode = #tpu.pipeline_mode<synchronous>, transform_indices = @transform_1, window_bounds = array<i64: 128, 128>}, {transform_indices = @transform_2, window_bounds = array<i64: 128, 1>}, {pipeline_mode = #tpu.pipeline_mode<synchronous>, transform_indices = @transform_3, window_bounds = array<i64: 1, 128>}, {transform_indices = @transform_4, window_bounds = array<i64: 128, 128>}]} {
    %c0_i32 = arith.constant 0 : i32
    %0 = arith.cmpi eq, %arg1, %c0_i32 : i32
    %1 = arith.extui %0 : i1 to i32
    %c0_i32_0 = arith.constant 0 : i32
    %2 = arith.cmpi ne, %1, %c0_i32_0 : i32
    scf.if %2 {
      %cst_9 = arith.constant 0.000000e+00 : f32
      %15 = vector.broadcast %cst_9 : f32 to vector<128x128xf32>
      %c0_10 = arith.constant 0 : index
      %c0_11 = arith.constant 0 : index
      %16 = vector.load %arg6[%c0_10, %c0_11] : memref<128x128xf32, #tpu.memory_space<vmem>>, vector<128x128xf32>
      tpu.vector_store %arg6[%c0_10, %c0_11], %15 {strides = array<i32>} : memref<128x128xf32, #tpu.memory_space<vmem>>, vector<128x128xf32>,
    } else {
    }
    %c128_i32 = arith.constant 128 : i32
    %3 = arith.muli %arg1, %c128_i32 : i32
    %4 = tpu.assume_multiple %3, 128 : i32
    %5 = arith.index_cast %4 : i32 to index
    %c0 = arith.constant 0 : index
    %6 = vector.load %arg3[%5, %c0] : memref<128x128xbf16, #tpu.memory_space<vmem>>, vector<128x128xbf16>
    %c0_1 = arith.constant 0 : index
    %c0_2 = arith.constant 0 : index
    %7 = vector.load %arg6[%c0_1, %c0_2] : memref<128x128xf32, #tpu.memory_space<vmem>>, vector<128x128xf32>
    %c0_3 = arith.constant 0 : index
    %c0_4 = arith.constant 0 : index
    %8 = vector.load %arg2[%c0_3, %c0_4] : memref<128x128xbf16, #tpu.memory_space<vmem>>, vector<128x128xbf16>
    %cst = arith.constant dense<0.000000e+00> : vector<128x128xf32>
    %9 = tpu.matmul %8, %6, %cst {dimension_numbers = #tpu.dot_dimension_numbers<[1], [0], [0], [1], [0, 0, 1, 1], [], []>} : vector<128x128xbf16>, vector<128x128xbf16>, vector<128x128xf32> -> vector<128x128xf32>
    %10 = arith.addf %7, %9 : vector<128x128xf32>
    %c0_5 = arith.constant 0 : index
    %c0_6 = arith.constant 0 : index
    %11 = vector.load %arg6[%c0_5, %c0_6] : memref<128x128xf32, #tpu.memory_space<vmem>>, vector<128x128xf32>
    tpu.vector_store %arg6[%c0_5, %c0_6], %10 {strides = array<i32>} : memref<128x128xf32, #tpu.memory_space<vmem>>, vector<128x128xf32>,
    %c0_i32_7 = arith.constant 0 : i32
    %12 = arith.cmpi eq, %arg1, %c0_i32_7 : i32
    %13 = arith.extui %12 : i1 to i32
    %c0_i32_8 = arith.constant 0 : i32
    %14 = arith.cmpi ne, %13, %c0_i32_8 : i32
    scf.if %14 {
      %c0_9 = arith.constant 0 : index
      %c0_10 = arith.constant 0 : index
      %15 = vector.load %arg4[%c0_9, %c0_10] : memref<128x1xf32, #tpu.memory_space<vmem>>, vector<128x1xf32>
      %c0_11 = arith.constant 0 : index
      %c0_12 = arith.constant 0 : index
      %16 = vector.load %arg6[%c0_11, %c0_12] : memref<128x128xf32, #tpu.memory_space<vmem>>, vector<128x128xf32>
      %17 = vector.broadcast %15 : vector<128x1xf32> to vector<128x128xf32>
      %18 = arith.mulf %17, %16 : vector<128x128xf32>
      %c0_13 = arith.constant 0 : index
      %c0_14 = arith.constant 0 : index
      %19 = vector.load %arg5[%c0_13, %c0_14] : memref<1x128xf32, #tpu.memory_space<vmem>>, vector<1x128xf32>
      %20 = vector.broadcast %19 : vector<1x128xf32> to vector<128x128xf32>
      %21 = arith.addf %18, %20 : vector<128x128xf32>
      %c0_15 = arith.constant 0 : index
      %c0_16 = arith.constant 0 : index
      %22 = vector.load %arg6[%c0_15, %c0_16] : memref<128x128xf32, #tpu.memory_space<vmem>>, vector<128x128xf32>
      tpu.vector_store %arg6[%c0_15, %c0_16], %21 {strides = array<i32>} : memref<128x128xf32, #tpu.memory_space<vmem>>, vector<128x128xf32>,
    } else {
    }
    return
  }
  func.func @transform_0(%arg0: i32, %arg1: i32) -> (i32, i32) {
    %c0_i32 = arith.constant 0 : i32
    return %arg0, %arg1 : i32, i32
  }
  func.func @transform_1(%arg0: i32, %arg1: i32) -> (i32, i32) {
    %c0_i32 = arith.constant 0 : i32
    %c0_i32_0 = arith.constant 0 : i32
    %c0_i32_1 = arith.constant 0 : i32
    return %c0_i32, %c0_i32_0 : i32, i32
  }
  func.func @transform_2(%arg0: i32, %arg1: i32) -> (i32, i32) {
    %c0_i32 = arith.constant 0 : i32
    %c0_i32_0 = arith.constant 0 : i32
    return %arg0, %c0_i32 : i32, i32
  }
  func.func @transform_3(%arg0: i32, %arg1: i32) -> (i32, i32) {
    %c0_i32 = arith.constant 0 : i32
    %c0_i32_0 = arith.constant 0 : i32
    %c0_i32_1 = arith.constant 0 : i32
    return %c0_i32, %c0_i32_0 : i32, i32
  }
  func.func @transform_4(%arg0: i32, %arg1: i32) -> (i32, i32) {
    %c0_i32 = arith.constant 0 : i32
    %c0_i32_0 = arith.constant 0 : i32
    return %arg0, %c0_i32 : i32, i32
  }
}

</mosaic_0001>

<bundles_post_ra>
// kernel: gcn_conv.1
= control target key start
LH: loop header
LB: loop body
LE: loop exit
PB: predicated region body
PF: predicated region fallthrough
CT: control target
= control target key end

     0   :  { %v593_v1 = vmov 0   ;;  %s769_s1 = inlined_call_operand.vmem [shape: bf16[128,128], index: 1, kind: input, shape index: {}]   ;;  %s770_s0 = inlined_call_operand.vmem [shape: bf16[128,128], index: 0, kind: input, shape index: {}]   ;;  %s771_s2 = inlined_call_operand.vmem [shape: f32[128,1], index: 2, kind: input, shape index: {}]   ;;  %s772_s3 = inlined_call_operand.vmem [shape: f32[1,128], index: 3, kind: input, shape index: {}]   ;;  %s773_s4 = inlined_call_operand.vmem [shape: f32[128,128], index: 4, kind: output, shape index: {}]  }
   0x1   :  { %v577_v0 = vld [vmem:[%s769_s1] sm:$0xff]   ;;  %576 = vset.pattern.permute.xlu1 %v593_v1  ;;  %575 = vset.pattern.permute.xlu0 %v593_v1  ;;  %v578_v2 = vld [vmem:[%s769_s1 + $0x8] sm:$0xff]   ;;  %v579_v3 = vld [vmem:[%s769_s1 + $0x10] sm:$0xff]  }
   0x2   :  { %525 = vmatprep.subr.bf16.mxu0 %v577_v0  ;;  %557 = vmatprep.subr.bf16.mxu1 %v577_v0  ;;  %v580_v4 = vld [vmem:[%s769_s1 + $0x18] sm:$0xff]   ;;  %v585_v5 = vld [vmem:[%s770_s0] sm:$0xff]   ;;  %v582_v8 = vld [vmem:[%s769_s1 + $0x28] sm:$0xff]  }
   0x3   :  { %526 = vmatpush3.bf16.msra.mxu0 %v577_v0  ;;  %565 = vmatpush3.bf16.msra.mxu1 %v577_v0  ;;  %v586_v6 = vld [vmem:[%s770_s0 + $0x20] sm:$0xff]   ;;  %v321_v9 = vld [vmem:[%s771_s2 + $0x10] sm:$0xff]  ;;  %v322_v11 = vld [vmem:[%s771_s2 + $0x18] sm:$0xff] }
   0x4   :  { %527 = vmatprep.subr.bf16.mxu0 %v578_v2  ;;  %558 = vmatprep.subr.bf16.mxu1 %v578_v2  ;;  %v581_v7 = vld [vmem:[%s769_s1 + $0x20] sm:$0xff]   ;;  %v320_v12 = vld [vmem:[%s771_s2 + $0x8] sm:$0xff]  ;;  %v583_v13 = vld [vmem:[%s769_s1 + $0x30] sm:$0xff]  }
   0x5   :  { %541 = vmatprep.mubr.bf16.mxu0 %v585_v5  ;;  %549 = vmatprep.mubr.bf16.mxu1 %v586_v6  ;;  %v319_v10 = vld [vmem:[%s771_s2] sm:$0xff]  ;;  %v324_v14 = vld [vmem:[%s771_s2 + $0x28] sm:$0xff]  ;;  %v584_v16 = vld [vmem:[%s769_s1 + $0x38] sm:$0xff]  }
   0x6   :  { %363 = vperm.xlu1 %576, %v321_v9   ;;  %353 = vperm.xlu0 %575, %v319_v10   ;;  %v323_v15 = vld [vmem:[%s771_s2 + $0x20] sm:$0xff]  ;;  %v326_v17 = vld [vmem:[%s771_s2 + $0x38] sm:$0xff]  ;;  %v325_v18 = vld [vmem:[%s771_s2 + $0x30] sm:$0xff] }
   0x7   :  { %528 = vmatpush3.bf16.msra.mxu0 %v578_v2  ;;  %566 = vmatpush3.bf16.msra.mxu1 %v578_v2  ;;  %v587_v19 = vld [vmem:[%s770_s0 + $0x8] sm:$0xff]   ;;  %v327_v22 = vld [vmem:[%s771_s2 + $0x40] sm:$0xff]  ;;  %v589_v23 = vld [vmem:[%s770_s0 + $0x10] sm:$0xff]  }
   0x8   :  { %529 = vmatprep.subr.bf16.mxu0 %v579_v3  ;;  %559 = vmatprep.subr.bf16.mxu1 %v579_v3  ;;  %v588_v20 = vld [vmem:[%s770_s0 + $0x28] sm:$0xff]   ;;  %v590_v24 = vld [vmem:[%s770_s0 + $0x30] sm:$0xff]   ;;  %v330_v25 = vld [vmem:[%s771_s2 + $0x58] sm:$0xff] }
   0x9   :  { %v328_v21 = vld [vmem:[%s771_s2 + $0x48] sm:$0xff]  ;;  %v329_v26 = vld [vmem:[%s771_s2 + $0x50] sm:$0xff]  ;;  %v591_v27 = vld [vmem:[%s770_s0 + $0x18] sm:$0xff]  }
   0xa   :  { %368 = vperm.xlu1 %576, %v322_v11   ;;  %358 = vperm.xlu0 %575, %v320_v12   ;;  %v592_v28 = vld [vmem:[%s770_s0 + $0x38] sm:$0xff]   ;;  %v332_v29 = vld [vmem:[%s771_s2 + $0x68] sm:$0xff]  ;;  %v331_v30 = vld [vmem:[%s771_s2 + $0x60] sm:$0xff] }
   0xb   :  { %530 = vmatpush3.bf16.msra.mxu0 %v579_v3  ;;  %567 = vmatpush3.bf16.msra.mxu1 %v579_v3  ;;  %v334_v31 = vld [vmem:[%s771_s2 + $0x78] sm:$0xff]  ;;  %v333_v32 = vld [vmem:[%s771_s2 + $0x70] sm:$0xff]  ;;  %v508_v50 = vld [vmem:[%s772_s3] ss:$0 sm:$0xff] }
   0xc   :  { %531 = vmatprep.subr.bf16.mxu0 %v580_v4  ;;  %560 = vmatprep.subr.bf16.mxu1 %v580_v4 }
   0xe   :  { %378 = vperm.xlu1 %576, %v324_v14   ;;  %373 = vperm.xlu0 %575, %v323_v15  }
   0xf   :  { %532 = vmatpush3.bf16.msra.mxu0 %v580_v4  ;;  %568 = vmatpush3.bf16.msra.mxu1 %v580_v4 }
  0x10   :  { %533 = vmatprep.subr.bf16.mxu0 %v581_v7  ;;  %561 = vmatprep.subr.bf16.mxu1 %v581_v7 }
  0x12   :  { %388 = vperm.xlu1 %576, %v326_v17   ;;  %383 = vperm.xlu0 %575, %v325_v18  }
  0x13   :  { %534 = vmatpush3.bf16.msra.mxu0 %v581_v7  ;;  %569 = vmatpush3.bf16.msra.mxu1 %v581_v7 }
  0x14   :  { %535 = vmatprep.subr.bf16.mxu0 %v582_v8  ;;  %562 = vmatprep.subr.bf16.mxu1 %v582_v8 }
  0x16   :  { %398 = vperm.xlu1 %576, %v328_v21   ;;  %393 = vperm.xlu0 %575, %v327_v22  }
  0x17   :  { %536 = vmatpush3.bf16.msra.mxu0 %v582_v8  ;;  %570 = vmatpush3.bf16.msra.mxu1 %v582_v8 }
  0x18   :  { %537 = vmatprep.subr.bf16.mxu0 %v583_v13  ;;  %563 = vmatprep.subr.bf16.mxu1 %v583_v13 }
  0x1a   :  { %408 = vperm.xlu1 %576, %v330_v25   ;;  %403 = vperm.xlu0 %575, %v329_v26  }
  0x1b   :  { %538 = vmatpush3.bf16.msra.mxu0 %v583_v13  ;;  %571 = vmatpush3.bf16.msra.mxu1 %v583_v13 }
  0x1c   :  { %539 = vmatprep.subr.bf16.mxu0 %v584_v16  ;;  %564 = vmatprep.subr.bf16.mxu1 %v584_v16 }
  0x1e   :  { %418 = vperm.xlu1 %576, %v332_v29   ;;  %413 = vperm.xlu0 %575, %v331_v30  }
  0x1f   :  { %540 = vmatpush3.bf16.msra.mxu0 %v584_v16  ;;  %572 = vmatpush3.bf16.msra.mxu1 %v584_v16 }
  0x22   :  { %542 = vmatmul.mubr.bf16.vlgmr.msra.gmra.mrb[0].mxu0 %v587_v19  ;;  %550 = vmatmul.mubr.bf16.vlgmr.msra.gmra.mrb[0].mxu1 %v588_v20 }
  0x23   :  { %545 = vmatprep.mubr.bf16.mxu0 %v589_v23  ;;  %553 = vmatprep.mubr.bf16.mxu1 %v590_v24 }
  0x24   :  { %428 = vperm.xlu1 %576, %v334_v31   ;;  %423 = vperm.xlu0 %575, %v333_v32  }
  0x2a   :  { %546 = vmatmul.mubr.bf16.gmra.mrb[4].mxu0 %v591_v27  ;;  %554 = vmatmul.mubr.bf16.gmra.mrb[4].mxu1 %v592_v28 }
  0x85   :  { %v354_v33 = vpop.permute.xlu0 %353  ;;  %v364_v34 = vpop.permute.xlu1 %363 }
  0x89   :  { %v359_v35 = vpop.permute.xlu0 %358  ;;  %v369_v36 = vpop.permute.xlu1 %368 }
  0x8d   :  { %v374_v37 = vpop.permute.xlu0 %373  ;;  %v715_v38 = vpop.permute.xlu1 %378 }
  0x91   :  { %v384_v39 = vpop.permute.xlu0 %383  ;;  %v389_v40 = vpop.permute.xlu1 %388 }
  0x95   :  { %v394_v41 = vpop.permute.xlu0 %393  ;;  %v399_v42 = vpop.permute.xlu1 %398 }
  0x99   :  { %v404_v43 = vpop.permute.xlu0 %403  ;;  %v409_v44 = vpop.permute.xlu1 %408 }
  0x9d   :  { %v414_v45 = vpop.permute.xlu0 %413  ;;  %v419_v63 = vpop.permute.xlu1 %418 }
  0xa3   :  { %v424_v4 = vpop.permute.xlu0 %423  ;;  %v429_v19 = vpop.permute.xlu1 %428 }
  0xf5   :  { %v543_v46 = vpop.f32.mrb[0].mxu0  ;;  %v551_v47 = vpop.f32.mrb[0].mxu1 }
  0xf6   :  { %v221_v48 = vpop.f32.mrb[1].mxu0  ;;  %v253_v49 = vpop.f32.mrb[1].mxu1  ;;  %v433_v53 = vmul.f32 %v543_v46, %v364_v34  ;;  %v441_v54 = vmul.f32 %v551_v47, %v404_v43 }
  0xf7   :  { %v544_v51 = vpop.f32.mrb[2].mxu0  ;;  %v552_v52 = vpop.f32.mrb[2].mxu1  ;;  %v431_v57 = vmul.f32 %v354_v33, %v221_v48  ;;  %v439_v58 = vmul.f32 %v394_v41, %v253_v49 }
  0xf8   :  { %v224_v55 = vpop.f32.mrb[3].mxu0  ;;  %v256_v56 = vpop.f32.mrb[3].mxu1  ;;  %v456_v59 = vadd.f32 %v508_v50, %v433_v53  ;;  %v464_v60 = vadd.f32 %v508_v50, %v441_v54  ;;  %v434_v61 = vmul.f32 %v544_v51, %v369_v36  ;;  %v442_v62 = vmul.f32 %v552_v52, %v409_v44 }
  0xf9   :  { %v454_v0 = vadd.f32 %v508_v50, %v431_v57  ;;  %v462_v1 = vadd.f32 %v508_v50, %v439_v58  ;;  %v432_v2 = vmul.f32 %v359_v35, %v224_v55  ;;  %v440_v3 = vmul.f32 %v399_v42, %v256_v56 }
  0xfa   :  { %472 = vst [vmem:[%s773_s4 + $0x10] sm:$0xff] %v456_v59  ;;  %480 = vst [vmem:[%s773_s4 + $0x50] sm:$0xff] %v464_v60  ;;  %v457_v5 = vadd.f32 %v508_v50, %v434_v61  ;;  %v465_v6 = vadd.f32 %v508_v50, %v442_v62 }
  0xfb   :  { %470 = vst [vmem:[%s773_s4] sm:$0xff] %v454_v0  ;;  %478 = vst [vmem:[%s773_s4 + $0x40] sm:$0xff] %v462_v1  ;;  %v455_v7 = vadd.f32 %v508_v50, %v432_v2  ;;  %v463_v8 = vadd.f32 %v508_v50, %v440_v3 }
  0xfc   :  { %473 = vst [vmem:[%s773_s4 + $0x18] sm:$0xff] %v457_v5  ;;  %481 = vst [vmem:[%s773_s4 + $0x58] sm:$0xff] %v465_v6 }
  0xfd   :  { %v547_v9 = vpop.f32.mrb[4].mxu0  ;;  %v555_v10 = vpop.f32.mrb[4].mxu1  ;;  %471 = vst [vmem:[%s773_s4 + $0x8] sm:$0xff] %v455_v7  ;;  %479 = vst [vmem:[%s773_s4 + $0x48] sm:$0xff] %v463_v8 }
  0xfe   :  { %v237_v11 = vpop.f32.mrb[5].mxu0  ;;  %v269_v12 = vpop.f32.mrb[5].mxu1  ;;  %v437_v15 = vmul.f32 %v547_v9, %v384_v39  ;;  %v445_v16 = vmul.f32 %v555_v10, %v424_v4 }
  0xff   :  { %v548_v13 = vpop.f32.mrb[6].mxu0  ;;  %v556_v14 = vpop.f32.mrb[6].mxu1  ;;  %v435_v20 = vmul.f32 %v374_v37, %v237_v11  ;;  %v443_v21 = vmul.f32 %v414_v45, %v269_v12 }
 0x100   :  { %v240_v17 = vpop.f32.mrb[7].mxu0  ;;  %v272_v18 = vpop.f32.mrb[7].mxu1  ;;  %v460_v22 = vadd.f32 %v508_v50, %v437_v15  ;;  %v468_v23 = vadd.f32 %v508_v50, %v445_v16  ;;  %v438_v24 = vmul.f32 %v548_v13, %v389_v40  ;;  %v446_v25 = vmul.f32 %v556_v14, %v429_v19 }
 0x101   :  { %v458_v26 = vadd.f32 %v508_v50, %v435_v20  ;;  %v466_v27 = vadd.f32 %v508_v50, %v443_v21  ;;  %v436_v28 = vmul.f32 %v715_v38, %v240_v17  ;;  %v444_v29 = vmul.f32 %v419_v63, %v272_v18 }
 0x102   :  { %476 = vst [vmem:[%s773_s4 + $0x30] sm:$0xff] %v460_v22  ;;  %484 = vst [vmem:[%s773_s4 + $0x70] sm:$0xff] %v468_v23  ;;  %v461_v30 = vadd.f32 %v508_v50, %v438_v24  ;;  %v469_v31 = vadd.f32 %v508_v50, %v446_v25 }
 0x103   :  { %474 = vst [vmem:[%s773_s4 + $0x20] sm:$0xff] %v458_v26  ;;  %482 = vst [vmem:[%s773_s4 + $0x60] sm:$0xff] %v466_v27  ;;  %v459_v32 = vadd.f32 %v508_v50, %v436_v28  ;;  %v467_v33 = vadd.f32 %v508_v50, %v444_v29 }
 0x104   :  { %477 = vst [vmem:[%s773_s4 + $0x38] sm:$0xff] %v461_v30  ;;  %485 = vst [vmem:[%s773_s4 + $0x78] sm:$0xff] %v469_v31 }
 0x105   :  { %475 = vst [vmem:[%s773_s4 + $0x28] sm:$0xff] %v459_v32  ;;  %483 = vst [vmem:[%s773_s4 + $0x68] sm:$0xff] %v467_v33 }

</bundles_post_ra>
